<compile_context>
chip_gen: v7x
topology: tpu7x:2x2x1
jax: 0.10.0
libtpu: 0.0.40
codegen_flags: <defaults>
</compile_context>

<pallas_src>
import numpy as np
import jax
import jax.numpy as jnp
from jax.experimental import pallas as pl
from jax.experimental.pallas import tpu as pltpu

TWO_PI = 2.0 * np.pi
NEG_SLOPE = 0.1          # LeakyReLU negative slope from the module


def network2_kernel(x_ref, w1_ref, b1_ref, w3_ref, b3_ref, o_ref):
    # linear_1
    h1 = jnp.dot(x_ref[...], w1_ref[...],
                 preferred_element_type=jnp.float32) + b1_ref[...]
    # LeakyReLU(negative_slope=0.1): max(x, 0.1*x)
    h1 = jnp.maximum(h1, NEG_SLOPE * h1)
    # TODO(synk): nn.Dropout(p=0.25) is implemented as inference-mode identity
    #             (no train-time RNG mask).
    # linear_3 (native output width; (TB, O) block is legal since O == full dim)
    h3 = jnp.dot(h1, w3_ref[...],
                 preferred_element_type=jnp.float32) + b3_ref[...]
    # sigmoid via single EUP tanh (full f32 accuracy), scaled by 2*pi
    o_ref[...] = (0.5 * jnp.tanh(0.5 * h3) + 0.5) * TWO_PI


def _forward_impl(x, w1, b1, w3, b3):
    B, D = x.shape
    n = w1.shape[1]
    O = w3.shape[1]

    # At most 2 grid steps: 2 so both v7x TensorCores get a tile ("parallel"
    # axis); on single-TC v5e/v6e the extra step boundary is negligible.
    num_steps = 2 if B >= 16 else 1
    TB = ((B + num_steps - 1) // num_steps + 7) // 8 * 8   # sublane multiple
    grid = (pl.cdiv(B, TB),)

    return pl.pallas_call(
        network2_kernel,
        out_shape=jax.ShapeDtypeStruct((B, O), jnp.float32),
        grid=grid,
        in_specs=[
            pl.BlockSpec((TB, D), lambda i: (i, 0)),   # x: tiled over batch
            pl.BlockSpec((D, n), lambda i: (0, 0)),    # w1 (VMEM-resident)
            pl.BlockSpec((1, n), lambda i: (0, 0)),    # b1
            pl.BlockSpec((n, O), lambda i: (0, 0)),    # w3 (VMEM-resident)
            pl.BlockSpec((1, O), lambda i: (0, 0)),    # b3
        ],
        out_specs=pl.BlockSpec((TB, O), lambda i: (i, 0)),
        compiler_params=pltpu.CompilerParams(
            dimension_semantics=("parallel",)),
    )(x, w1, b1, w3, b3)


forward = jax.jit(_forward_impl)


def reference_forward(x, w1, b1, w3, b3):
    """Pure numpy (f64) replica of the PyTorch forward (eval mode)."""
    h1 = x @ w1 + b1
    h1 = np.where(h1 >= 0.0, h1, NEG_SLOPE * h1)   # LeakyReLU(0.1)
    h3 = h1 @ w3 + b3                              # dropout == identity (eval)
    return (1.0 / (1.0 + np.exp(-h3))) * TWO_PI


if __name__ == "__main__":
    # Small shapes consistent with the module; batch >= 128 so the MXU M dim
    # is filled and the 2-step grid has one tile per v7x TensorCore.
    input_size, n, output_size = 16, 64, 8
    B = 256

    key = jax.random.PRNGKey(0)
    ks = jax.random.split(key, 5)
    x  = jax.random.normal(ks[0], (B, input_size), jnp.float32)
    w1 = jax.random.normal(ks[1], (input_size, n), jnp.float32) / np.sqrt(input_size)
    b1 = 0.1 * jax.random.normal(ks[2], (1, n), jnp.float32)
    w3 = jax.random.normal(ks[3], (n, output_size), jnp.float32) / np.sqrt(n)
    b3 = 0.1 * jax.random.normal(ks[4], (1, output_size), jnp.float32)

    out = jax.block_until_ready(forward(x, w1, b1, w3, b3))

    ref = reference_forward(np.asarray(x, np.float64), np.asarray(w1, np.float64),
                            np.asarray(b1, np.float64), np.asarray(w3, np.float64),
                            np.asarray(b3, np.float64))
    np.testing.assert_allclose(np.asarray(out), ref, rtol=1e-4, atol=1e-4)
    print("KERNEL_OK")
</pallas_src>

<mosaic_0001>
module attributes {stable_mosaic.version = 11 : i64} {
  func.func @network2_kernel(%arg0: i32, %arg1: memref<128x16xf32, #tpu.memory_space<vmem>>, %arg2: memref<16x64xf32, #tpu.memory_space<vmem>>, %arg3: memref<1x64xf32, #tpu.memory_space<vmem>>, %arg4: memref<64x8xf32, #tpu.memory_space<vmem>>, %arg5: memref<1x8xf32, #tpu.memory_space<vmem>>, %arg6: memref<128x8xf32, #tpu.memory_space<vmem>>) attributes {dimension_semantics = [#tpu.dimension_semantics<parallel>], iteration_bounds = array<i64: 2>, scalar_prefetch = 0 : i64, scratch_operands = 0 : i64, tpu.core_type = #tpu.core_type<tc>, window_params = [{transform_indices = @transform_0, window_bounds = array<i64: 128, 16>}, {pipeline_mode = #tpu.pipeline_mode<synchronous>, transform_indices = @transform_1, window_bounds = array<i64: 16, 64>}, {pipeline_mode = #tpu.pipeline_mode<synchronous>, transform_indices = @transform_2, window_bounds = array<i64: 1, 64>}, {pipeline_mode = #tpu.pipeline_mode<synchronous>, transform_indices = @transform_3, window_bounds = array<i64: 64, 8>}, {pipeline_mode = #tpu.pipeline_mode<synchronous>, transform_indices = @transform_4, window_bounds = array<i64: 1, 8>}, {transform_indices = @transform_5, window_bounds = array<i64: 128, 8>}]} {
    %c0 = arith.constant 0 : index
    %c0_0 = arith.constant 0 : index
    %0 = vector.load %arg1[%c0, %c0_0] : memref<128x16xf32, #tpu.memory_space<vmem>>, vector<128x16xf32>
    %c0_1 = arith.constant 0 : index
    %c0_2 = arith.constant 0 : index
    %1 = vector.load %arg2[%c0_1, %c0_2] : memref<16x64xf32, #tpu.memory_space<vmem>>, vector<16x64xf32>
    %cst = arith.constant dense<0.000000e+00> : vector<128x64xf32>
    %2 = tpu.matmul %0, %1, %cst {dimension_numbers = #tpu.dot_dimension_numbers<[1], [0], [0], [1], [0, 0, 1, 1], [], []>} : vector<128x16xf32>, vector<16x64xf32>, vector<128x64xf32> -> vector<128x64xf32>
    %c0_3 = arith.constant 0 : index
    %c0_4 = arith.constant 0 : index
    %3 = vector.load %arg3[%c0_3, %c0_4] : memref<1x64xf32, #tpu.memory_space<vmem>>, vector<1x64xf32>
    %4 = vector.broadcast %3 : vector<1x64xf32> to vector<128x64xf32>
    %5 = arith.addf %2, %4 : vector<128x64xf32>
    %cst_5 = arith.constant 1.000000e-01 : f32
    %6 = vector.broadcast %cst_5 : f32 to vector<128x64xf32>
    %7 = arith.mulf %6, %5 : vector<128x64xf32>
    %8 = arith.maximumf %5, %7 : vector<128x64xf32>
    %c0_6 = arith.constant 0 : index
    %c0_7 = arith.constant 0 : index
    %9 = vector.load %arg4[%c0_6, %c0_7] : memref<64x8xf32, #tpu.memory_space<vmem>>, vector<64x8xf32>
    %cst_8 = arith.constant dense<0.000000e+00> : vector<128x8xf32>
    %10 = tpu.matmul %8, %9, %cst_8 {dimension_numbers = #tpu.dot_dimension_numbers<[1], [0], [0], [1], [0, 0, 1, 1], [], []>} : vector<128x64xf32>, vector<64x8xf32>, vector<128x8xf32> -> vector<128x8xf32>
    %c0_9 = arith.constant 0 : index
    %c0_10 = arith.constant 0 : index
    %11 = vector.load %arg5[%c0_9, %c0_10] : memref<1x8xf32, #tpu.memory_space<vmem>>, vector<1x8xf32>
    %12 = vector.broadcast %11 : vector<1x8xf32> to vector<128x8xf32>
    %13 = arith.addf %10, %12 : vector<128x8xf32>
    %cst_11 = arith.constant 5.000000e-01 : f32
    %14 = vector.broadcast %cst_11 : f32 to vector<128x8xf32>
    %15 = arith.mulf %14, %13 : vector<128x8xf32>
    %16 = math.tanh %15 : vector<128x8xf32>
    %cst_12 = arith.constant 5.000000e-01 : f32
    %17 = vector.broadcast %cst_12 : f32 to vector<128x8xf32>
    %18 = arith.mulf %17, %16 : vector<128x8xf32>
    %cst_13 = arith.constant 5.000000e-01 : f32
    %19 = vector.broadcast %cst_13 : f32 to vector<128x8xf32>
    %20 = arith.addf %18, %19 : vector<128x8xf32>
    %cst_14 = arith.constant 6.28318548 : f32
    %21 = vector.broadcast %cst_14 : f32 to vector<128x8xf32>
    %22 = arith.mulf %20, %21 : vector<128x8xf32>
    %c0_15 = arith.constant 0 : index
    %c0_16 = arith.constant 0 : index
    %23 = vector.load %arg6[%c0_15, %c0_16] : memref<128x8xf32, #tpu.memory_space<vmem>>, vector<128x8xf32>
    tpu.vector_store %arg6[%c0_15, %c0_16], %22 {strides = array<i32>} : memref<128x8xf32, #tpu.memory_space<vmem>>, vector<128x8xf32>,
    return
  }
  func.func @transform_0(%arg0: i32) -> (i32, i32) {
    %c0_i32 = arith.constant 0 : i32
    %c0_i32_0 = arith.constant 0 : i32
    return %arg0, %c0_i32 : i32, i32
  }
  func.func @transform_1(%arg0: i32) -> (i32, i32) {
    %c0_i32 = arith.constant 0 : i32
    %c0_i32_0 = arith.constant 0 : i32
    %c0_i32_1 = arith.constant 0 : i32
    return %c0_i32, %c0_i32_0 : i32, i32
  }
  func.func @transform_2(%arg0: i32) -> (i32, i32) {
    %c0_i32 = arith.constant 0 : i32
    %c0_i32_0 = arith.constant 0 : i32
    %c0_i32_1 = arith.constant 0 : i32
    return %c0_i32, %c0_i32_0 : i32, i32
  }
  func.func @transform_3(%arg0: i32) -> (i32, i32) {
    %c0_i32 = arith.constant 0 : i32
    %c0_i32_0 = arith.constant 0 : i32
    %c0_i32_1 = arith.constant 0 : i32
    return %c0_i32, %c0_i32_0 : i32, i32
  }
  func.func @transform_4(%arg0: i32) -> (i32, i32) {
    %c0_i32 = arith.constant 0 : i32
    %c0_i32_0 = arith.constant 0 : i32
    %c0_i32_1 = arith.constant 0 : i32
    return %c0_i32, %c0_i32_0 : i32, i32
  }
  func.func @transform_5(%arg0: i32) -> (i32, i32) {
    %c0_i32 = arith.constant 0 : i32
    %c0_i32_0 = arith.constant 0 : i32
    return %arg0, %c0_i32 : i32, i32
  }
}

</mosaic_0001>

<bundles_post_ra>
// kernel: _forward_impl.1
= control target key start
LH: loop header
LB: loop body
LE: loop exit
PB: predicated region body
PF: predicated region fallthrough
CT: control target
= control target key end

     0   :  { %s1102_s18 = smov 0   ;;  %s1282_s0 = inlined_call_operand.vmem [shape: f32[256,16], index: 0, kind: input, shape index: {}]   ;;  %s1283_s1 = inlined_call_operand.vmem [shape: f32[16,64], index: 1, kind: input, shape index: {}]   ;;  %s1284_s2 = inlined_call_operand.vmem [shape: f32[1,64], index: 2, kind: input, shape index: {}]   ;;  %s1285_s3 = inlined_call_operand.vmem [shape: f32[64,8], index: 3, kind: input, shape index: {}]   ;;  %s1286_s4 = inlined_call_operand.vmem [shape: f32[1,8], index: 4, kind: input, shape index: {}]   ;;  %s1287_s5 = inlined_call_operand.vmem [shape: f32[256,8], index: 5, kind: output, shape index: {}]  }
   0x1 LB: > { %s841_s19 = sadd.s32 4294967295, %s1070_s18   ;;  %p845_p0 = scmp.ge.s32.totalorder %s1070_s18, 1  ;;  %s1070_s18 = sphi %s1102_s18, %s15_s18  }
   0x2   : > { %p188_p1 = scmp.lt.s32.totalorder %s1070_s18, 3 }
   0x4   : > { %p189_p2 = pnand %p845_p0, %p188_p1 }
   0x5   : > { %v244_v0 = vld [vmem:[%s1283_s1] sm:$0xff] (!%p189_p2)  ;;  %v245_v1 = vld [vmem:[%s1283_s1 + $0x8] sm:$0xff] (!%p189_p2)  ;;  %s846_s24 = sshll.u32 (!%p189_p2), %s841_s19, 4  ;;  %v481_v5 = vld [vmem:[%s1285_s3 + $0x10] sm:$0xff] (!%p189_p2)  ;;  %vm253_vm0 = vcmask (!%p189_p2), 130048   ;;  %vm494_vm1 = vcmask (!%p189_p2), 523264  }
   0x6   : > { %192 = sbr.rel (%p189_p2) target bundleno = 501 (0x1f5), region = 40  ;;  %v479_v2 = vld [vmem:[%s1285_s3] sm:$0xff] (!%p189_p2)  ;;  %v996_v3 = vpack.c.bf16 (!%p189_p2), %v245_v1, %v244_v0  ;;  %p217_p3 = scmp.lt.s32.totalorder (!%p189_p2), %s846_s24, 31  ;;  %v480_v4 = vld [vmem:[%s1285_s3 + $0x8] sm:$0xff] (!%p189_p2)  ;;  %v482_v6 = vld [vmem:[%s1285_s3 + $0x18] sm:$0xff] (!%p189_p2)  ;;  %vm768_vm2 = vcmask (!%p189_p2), 64512  }
   0x7   : > { %v1000_v7 = vpack.c.bf16 (!%p189_p2), %v480_v4, %v479_v2  ;;  %v1004_v8 = vpack.c.bf16 (!%p189_p2), %v482_v6, %v481_v5  ;;  %v483_v25 = vld [vmem:[%s1285_s3 + $0x20] sm:$0xff] (!%p189_p2)  ;;  %v484_v26 = vld [vmem:[%s1285_s3 + $0x28] sm:$0xff] (!%p189_p2)  ;;  %v485_v28 = vld [vmem:[%s1285_s3 + $0x30] sm:$0xff] (!%p189_p2) }
   0x8   : > { %997 = vmatprep.subr.bf16.mxu0 (!%p189_p2), %v996_v3  ;;  %v1008_v27 = vpack.c.bf16 (!%p189_p2), %v484_v26, %v483_v25  ;;  %v486_v29 = vld [vmem:[%s1285_s3 + $0x38] sm:$0xff] (!%p189_p2)  ;;  %v1185_v31 = vld [vmem:[%s1284_s2] ss:$0 sm:$0xff] (!%p189_p2) }
   0x9   : > { %999 = vmatpush3.bf16.msra.mxu0 (!%p189_p2), %v996_v3  ;;  %1016 = vmatprep.subr.bf16.mxu1 (!%p189_p2), %v1000_v7  ;;  %v1012_v30 = vpack.c.bf16 (!%p189_p2), %v486_v29, %v485_v28 }
   0xa   : > { %1001 = vmatprep.subr.bf16.mxu0 (!%p189_p2), %v1000_v7  ;;  %1020 = vmatpush3.bf16.msra.mxu1 (!%p189_p2), %v1000_v7 }
   0xb   : > { %1017 = vmatprep.subr.bf16.mxu1 (!%p189_p2), %v1004_v8 }
   0xd   : > { %s1289_s24 = smov (!%p217_p3, %s846_s24), 31 }
   0xe   : > { %s847_s8 = sshll.u32 %s1289_s24, 3  ;;  %1021 = vmatpush3.bf16.msra.mxu1 %v1004_v8 }
   0xf   : > { %s1136_s11 = scalar_lea.vmem %s1282_s0, %s847_s8  ;;  %1018 = vmatprep.subr.bf16.mxu1 %v1008_v27  ;;  %s1239_s28 = scalar_lea.vmem %s1287_s5, %s847_s8 }
  0x10   : > { %v228_v9 = vld [vmem:[%s1136_s11] sm:$0xff]  ;;  %v229_v10 = vld [vmem:[%s1136_s11 + $0x8] sm:$0xff]  ;;  %v230_v11 = vld [vmem:[%s1136_s11 + $0x10] sm:$0xff] }
  0x11   : > { %932 = vmatprep.mubr.msk.f32.mxu0 %vm253_vm0, %v228_v9  ;;  %v231_v12 = vld [vmem:[%s1136_s11 + $0x18] sm:$0xff]  ;;  %v232_v13 = vld [vmem:[%s1136_s11 + $0x20] sm:$0xff]  ;;  %v233_v14 = vld [vmem:[%s1136_s11 + $0x28] sm:$0xff] }
  0x12   : > { %933 = vmatmul.mubr.msk.f32.vlgmr.msra.gmra.mrb[0].mxu0 %vm253_vm0, %v229_v10  ;;  %v234_v15 = vld [vmem:[%s1136_s11 + $0x30] sm:$0xff]  ;;  %v235_v16 = vld [vmem:[%s1136_s11 + $0x38] sm:$0xff]  ;;  %v236_v17 = vld [vmem:[%s1136_s11 + $0x40] sm:$0xff]  ;;  %1022 = vmatpush3.bf16.msra.mxu1 %v1008_v27 }
  0x13   : > { %935 = vmatprep.mubr.msk.f32.mxu0 %vm253_vm0, %v230_v11  ;;  %1003 = vmatpush3.bf16.msra.mxu0 %v1000_v7  ;;  %v237_v18 = vld [vmem:[%s1136_s11 + $0x48] sm:$0xff]  ;;  %v238_v19 = vld [vmem:[%s1136_s11 + $0x50] sm:$0xff]  ;;  %v239_v20 = vld [vmem:[%s1136_s11 + $0x58] sm:$0xff] }
  0x14   : > { %1005 = vmatprep.subr.bf16.mxu0 %v1004_v8  ;;  %v240_v21 = vld [vmem:[%s1136_s11 + $0x60] sm:$0xff]  ;;  %v241_v22 = vld [vmem:[%s1136_s11 + $0x68] sm:$0xff]  ;;  %v242_v23 = vld [vmem:[%s1136_s11 + $0x70] sm:$0xff]  ;;  %1019 = vmatprep.subr.bf16.mxu1 %v1012_v30 }
  0x15   : > { %v243_v24 = vld [vmem:[%s1136_s11 + $0x78] sm:$0xff] }
  0x16   : > { %936 = vmatmul.mubr.msk.f32.gmra.mrb[2].mxu0 %vm253_vm0, %v231_v12  ;;  %1023 = vmatpush3.bf16.msra.mxu1 %v1012_v30 }
  0x17   : > { %938 = vmatprep.mubr.msk.f32.mxu0 %vm253_vm0, %v232_v13  ;;  %1007 = vmatpush3.bf16.msra.mxu0 %v1004_v8 }
  0x18   : > { %1009 = vmatprep.subr.bf16.mxu0 %v1008_v27 }
  0x1a   : > { %939 = vmatmul.mubr.msk.f32.gmra.mrb[4].mxu0 %vm253_vm0, %v233_v14 }
  0x1b   : > { %941 = vmatprep.mubr.msk.f32.mxu0 %vm253_vm0, %v234_v15  ;;  %1011 = vmatpush3.bf16.msra.mxu0 %v1008_v27 }
  0x1c   : > { %1013 = vmatprep.subr.bf16.mxu0 %v1012_v30 }
  0x1e   : > { %942 = vmatmul.mubr.msk.f32.gmra.mrb[6].mxu0 %vm253_vm0, %v235_v16 }
  0x1f   : > { %944 = vmatprep.mubr.msk.f32.mxu0 %vm253_vm0, %v236_v17  ;;  %1015 = vmatpush3.bf16.msra.mxu0 %v1012_v30 }
  0x22   : > { %945 = vmatmul.mubr.msk.f32.gmra.mrb[8].mxu0 %vm253_vm0, %v237_v18 }
  0x23   : > { %947 = vmatprep.mubr.msk.f32.mxu0 %vm253_vm0, %v238_v19 }
  0x26   : > { %948 = vmatmul.mubr.msk.f32.gmra.mrb[10].mxu0 %vm253_vm0, %v239_v20 }
  0x27   : > { %950 = vmatprep.mubr.msk.f32.mxu0 %vm253_vm0, %v240_v21 }
  0x2a   : > { %951 = vmatmul.mubr.msk.f32.gmra.mrb[12].mxu0 %vm253_vm0, %v241_v22 }
  0x2b   : > { %953 = vmatprep.mubr.msk.f32.mxu0 %vm253_vm0, %v242_v23 }
  0x2e   : > { %954 = vmatmul.mubr.msk.f32.gmra.mrb[14].mxu0 %vm253_vm0, %v243_v24 }
  0xe5   : > { %v934_v32 = vpop.f32.mrb[0].mxu0 }
  0xe6   : > { %v374_v33 = vadd.f32 %v934_v32, %v1185_v31  ;;  %v368_v34 = vpop.f32.mrb[1].mxu0 }
  0xe7   : > { %v369_v35 = vadd.f32 %v1185_v31, %v368_v34 }
  0xe8   : > { %v448_v36 = vmul.f32 0.1, %v374_v33 }
  0xe9   : > { %v447_v37 = vmul.f32 0.1, %v369_v35  ;;  %v937_v38 = vpop.f32.mrb[2].mxu0 }
  0xea   : > { %v384_v39 = vadd.f32 %v937_v38, %v1185_v31  ;;  %v378_v40 = vpop.f32.mrb[3].mxu0  ;;  %v464_v43 = vmax.f32 %v374_v33, %v448_v36  ;;  %v1222_v33 = vld [vmem:[%s1286_s4] ss:$0 sm:$0xff] }
  0xeb   : > { %v463_v41 = vmax.f32 %v369_v35, %v447_v37  ;;  %v379_v42 = vadd.f32 %v1185_v31, %v378_v40 }
  0xec   : > { %v450_v44 = vmul.f32 0.1, %v384_v39 }
  0xed   : > { %v449_v45 = vmul.f32 0.1, %v379_v42  ;;  %v940_v46 = vpop.f32.mrb[4].mxu0  ;;  %972 = vmatprep.mubr.msk.f32.mxu0 %vm494_vm1, %v463_v41 }
  0xee   : > { %v394_v47 = vadd.f32 %v940_v46, %v1185_v31  ;;  %v388_v48 = vpop.f32.mrb[5].mxu0  ;;  %973 = vmatmul.mubr.msk.f32.vlgmr.msra.gmra.mrb[16].mxu0 %vm494_vm1, %v464_v43  ;;  %v466_v51 = vmax.f32 %v384_v39, %v450_v44 }
  0xef   : > { %v389_v49 = vadd.f32 %v1185_v31, %v388_v48  ;;  %v465_v50 = vmax.f32 %v379_v42, %v449_v45 }
  0xf0   : > { %v452_v52 = vmul.f32 0.1, %v394_v47 }
  0xf1   : > { %v451_v53 = vmul.f32 0.1, %v389_v49  ;;  %v943_v54 = vpop.f32.mrb[6].mxu0  ;;  %975 = vmatprep.mubr.msk.f32.mxu1 %vm494_vm1, %v465_v50 }
  0xf2   : > { %v404_v55 = vadd.f32 %v943_v54, %v1185_v31  ;;  %v398_v56 = vpop.f32.mrb[7].mxu0  ;;  %976 = vmatmul.mubr.msk.f32.vlgmr.msra.gmra.mrb[0].mxu1 %vm494_vm1, %v466_v51  ;;  %v468_v59 = vmax.f32 %v394_v47, %v452_v52 }
  0xf3   : > { %v467_v57 = vmax.f32 %v389_v49, %v451_v53  ;;  %v399_v58 = vadd.f32 %v1185_v31, %v398_v56 }
  0xf4   : > { %v454_v60 = vmul.f32 0.1, %v404_v55 }
  0xf5   : > { %v453_v61 = vmul.f32 0.1, %v399_v58  ;;  %v946_v62 = vpop.f32.mrb[8].mxu0  ;;  %978 = vmatprep.mubr.msk.f32.mxu1 %vm494_vm1, %v467_v57 }
  0xf6   : > { %v414_v63 = vadd.f32 %v946_v62, %v1185_v31  ;;  %v408_v0 = vpop.f32.mrb[9].mxu0  ;;  %979 = vmatmul.mubr.msk.f32.gmra.mrb[2].mxu1 %vm494_vm1, %v468_v59  ;;  %v470_v3 = vmax.f32 %v404_v55, %v454_v60 }
  0xf7   : > { %v469_v1 = vmax.f32 %v399_v58, %v453_v61  ;;  %v409_v2 = vadd.f32 %v1185_v31, %v408_v0 }
  0xf8   : > { %v456_v4 = vmul.f32 0.1, %v414_v63 }
  0xf9   : > { %v455_v5 = vmul.f32 0.1, %v409_v2  ;;  %v949_v6 = vpop.f32.mrb[10].mxu0  ;;  %981 = vmatprep.mubr.msk.f32.mxu1 %vm494_vm1, %v469_v1 }
  0xfa   : > { %v424_v7 = vadd.f32 %v949_v6, %v1185_v31  ;;  %v418_v8 = vpop.f32.mrb[11].mxu0  ;;  %982 = vmatmul.mubr.msk.f32.gmra.mrb[4].mxu1 %vm494_vm1, %v470_v3  ;;  %v472_v11 = vmax.f32 %v414_v63, %v456_v4 }
  0xfb   : > { %v471_v9 = vmax.f32 %v409_v2, %v455_v5  ;;  %v419_v10 = vadd.f32 %v1185_v31, %v418_v8 }
  0xfc   : > { %v458_v12 = vmul.f32 0.1, %v424_v7 }
  0xfd   : > { %v457_v13 = vmul.f32 0.1, %v419_v10  ;;  %v952_v14 = vpop.f32.mrb[12].mxu0  ;;  %984 = vmatprep.mubr.msk.f32.mxu1 %vm494_vm1, %v471_v9 }
  0xfe   : > { %v434_v15 = vadd.f32 %v952_v14, %v1185_v31  ;;  %v428_v16 = vpop.f32.mrb[13].mxu0  ;;  %985 = vmatmul.mubr.msk.f32.gmra.mrb[6].mxu1 %vm494_vm1, %v472_v11  ;;  %v474_v19 = vmax.f32 %v424_v7, %v458_v12 }
  0xff   : > { %v473_v17 = vmax.f32 %v419_v10, %v457_v13  ;;  %v429_v18 = vadd.f32 %v1185_v31, %v428_v16 }
 0x100   : > { %v460_v20 = vmul.f32 0.1, %v434_v15 }
 0x101   : > { %v459_v21 = vmul.f32 0.1, %v429_v18  ;;  %v955_v22 = vpop.f32.mrb[14].mxu0  ;;  %987 = vmatprep.mubr.msk.f32.mxu1 %vm494_vm1, %v473_v17 }
 0x102   : > { %v444_v23 = vadd.f32 %v955_v22, %v1185_v31  ;;  %v438_v24 = vpop.f32.mrb[15].mxu0  ;;  %988 = vmatmul.mubr.msk.f32.gmra.mrb[8].mxu1 %vm494_vm1, %v474_v19  ;;  %v476_v27 = vmax.f32 %v434_v15, %v460_v20 }
 0x103   : > { %v475_v25 = vmax.f32 %v429_v18, %v459_v21  ;;  %v439_v26 = vadd.f32 %v1185_v31, %v438_v24 }
 0x104   : > { %v462_v28 = vmul.f32 0.1, %v444_v23 }
 0x105   : > { %v461_v29 = vmul.f32 0.1, %v439_v26  ;;  %990 = vmatprep.mubr.msk.f32.mxu1 %vm494_vm1, %v475_v25 }
 0x106   : > { %991 = vmatmul.mubr.msk.f32.gmra.mrb[10].mxu1 %vm494_vm1, %v476_v27  ;;  %v478_v32 = vmax.f32 %v444_v23, %v462_v28 }
 0x107   : > { %v477_v30 = vmax.f32 %v439_v26, %v461_v29 }
 0x109   : > { %993 = vmatprep.mubr.msk.f32.mxu1 %vm494_vm1, %v477_v30 }
 0x10a   : > { %994 = vmatmul.mubr.msk.f32.gmra.mrb[12].mxu1 %vm494_vm1, %v478_v32 }
 0x1c1   : > { %v974_v34 = vpop.f32.mrb[16].mxu0 }
 0x1c2   : > { %v615_v31 = vadd.f32 %v974_v34, %v1222_v33  ;;  %v609_v35 = vpop.f32.mrb[17].mxu0 }
 0x1c3   : > { %v610_v36 = vadd.f32 %v1222_v33, %v609_v35 }
 0x1c4   : > { %v689_v37 = vmul.f32 0.5, %v615_v31 }
 0x1c5   : > { %v688_v38 = vmul.f32 0.5, %v610_v36  ;;  %v977_v39 = vpop.f32.mrb[0].mxu1 }
 0x1c6   : > { %1032 = vtanh.f32 %v689_v37  ;;  %v625_v40 = vadd.f32 %v977_v39, %v1222_v33  ;;  %v619_v41 = vpop.f32.mrb[1].mxu1 }
 0x1c7   : > { %1034 = vtanh.f32 %v688_v38  ;;  %v620_v42 = vadd.f32 %v1222_v33, %v619_v41 }
 0x1c8   : > { %v691_v43 = vmul.f32 0.5, %v625_v40 }
 0x1c9   : > { %v690_v44 = vmul.f32 0.5, %v620_v42  ;;  %v980_v45 = vpop.f32.mrb[2].mxu1 }
 0x1ca   : > { %1036 = vtanh.f32 %v691_v43  ;;  %v635_v46 = vadd.f32 %v980_v45, %v1222_v33  ;;  %v629_v47 = vpop.f32.mrb[3].mxu1 }
 0x1cb   : > { %1038 = vtanh.f32 %v690_v44  ;;  %v630_v48 = vadd.f32 %v1222_v33, %v629_v47 }
 0x1cc   : > { %v693_v49 = vmul.f32 0.5, %v635_v46 }
 0x1cd   : > { %v692_v50 = vmul.f32 0.5, %v630_v48  ;;  %v983_v51 = vpop.f32.mrb[4].mxu1 }
 0x1ce   : > { %1040 = vtanh.f32 %v693_v49  ;;  %v645_v52 = vadd.f32 %v983_v51, %v1222_v33  ;;  %v639_v53 = vpop.f32.mrb[5].mxu1 }
 0x1cf   : > { %1042 = vtanh.f32 %v692_v50  ;;  %v640_v54 = vadd.f32 %v1222_v33, %v639_v53 }
 0x1d0   : > { %v1033_v55 = vpop.eup %1032  ;;  %v695_v56 = vmul.f32 0.5, %v645_v52 }
 0x1d1   : > { %v1035_v57 = vpop.eup %1034  ;;  %v721_v58 = vmul.f32 0.5, %v1033_v55  ;;  %v694_v59 = vmul.f32 0.5, %v640_v54  ;;  %v986_v60 = vpop.f32.mrb[6].mxu1 }
 0x1d2   : > { %v720_v61 = vmul.f32 0.5, %v1035_v57  ;;  %1044 = vtanh.f32 %v695_v56  ;;  %v655_v62 = vadd.f32 %v986_v60, %v1222_v33  ;;  %v649_v63 = vpop.f32.mrb[7].mxu1 }
 0x1d3   : > { %v737_v0 = vadd.f32 0.5, %v721_v58  ;;  %1046 = vtanh.f32 %v694_v59  ;;  %v650_v1 = vadd.f32 %v1222_v33, %v649_v63 }
 0x1d4   : > { %v1037_v2 = vpop.eup %1036  ;;  %v736_v3 = vadd.f32 0.5, %v720_v61  ;;  %v697_v4 = vmul.f32 0.5, %v655_v62 }
 0x1d5   : > { %v1039_v5 = vpop.eup %1038  ;;  %v753_v6 = vmul.f32 6.2831855, %v737_v0  ;;  %v723_v7 = vmul.f32 0.5, %v1037_v2  ;;  %v696_v8 = vmul.f32 0.5, %v650_v1  ;;  %v989_v9 = vpop.f32.mrb[8].mxu1 }
 0x1d6   : > { %v752_v10 = vmul.f32 6.2831855, %v736_v3  ;;  %v722_v11 = vmul.f32 0.5, %v1039_v5  ;;  %1048 = vtanh.f32 %v697_v4  ;;  %v665_v12 = vadd.f32 %v989_v9, %v1222_v33  ;;  %v659_v13 = vpop.f32.mrb[9].mxu1 }
 0x1d7   : > { %770 = vst.msk [vmem:[%s1239_s28 + $0x8] sm:$0xff] %vm768_vm2, %v753_v6  ;;  %v739_v14 = vadd.f32 0.5, %v723_v7  ;;  %1050 = vtanh.f32 %v696_v8  ;;  %v660_v15 = vadd.f32 %v1222_v33, %v659_v13 }
 0x1d8   : > { %v1041_v16 = vpop.eup %1040  ;;  %769 = vst.msk [vmem:[%s1239_s28] sm:$0xff] %vm768_vm2, %v752_v10  ;;  %v738_v17 = vadd.f32 0.5, %v722_v11  ;;  %v699_v18 = vmul.f32 0.5, %v665_v12 }
 0x1d9   : > { %v1043_v19 = vpop.eup %1042  ;;  %v755_v20 = vmul.f32 6.2831855, %v739_v14  ;;  %v725_v21 = vmul.f32 0.5, %v1041_v16  ;;  %v698_v22 = vmul.f32 0.5, %v660_v15  ;;  %v992_v23 = vpop.f32.mrb[10].mxu1 }
 0x1da   : > { %v754_v24 = vmul.f32 6.2831855, %v738_v17  ;;  %v724_v25 = vmul.f32 0.5, %v1043_v19  ;;  %1052 = vtanh.f32 %v699_v18  ;;  %v675_v26 = vadd.f32 %v992_v23, %v1222_v33  ;;  %v669_v27 = vpop.f32.mrb[11].mxu1 }
 0x1db   : > { %772 = vst.msk [vmem:[%s1239_s28 + $0x18] sm:$0xff] %vm768_vm2, %v755_v20  ;;  %v741_v28 = vadd.f32 0.5, %v725_v21  ;;  %1054 = vtanh.f32 %v698_v22  ;;  %v670_v29 = vadd.f32 %v1222_v33, %v669_v27 }
 0x1dc   : > { %v1045_v30 = vpop.eup %1044  ;;  %771 = vst.msk [vmem:[%s1239_s28 + $0x10] sm:$0xff] %vm768_vm2, %v754_v24  ;;  %v740_v32 = vadd.f32 0.5, %v724_v25  ;;  %v701_v34 = vmul.f32 0.5, %v675_v26 }
 0x1dd   : > { %v1047_v31 = vpop.eup %1046  ;;  %v757_v35 = vmul.f32 6.2831855, %v741_v28  ;;  %v727_v36 = vmul.f32 0.5, %v1045_v30  ;;  %v700_v37 = vmul.f32 0.5, %v670_v29  ;;  %v995_v38 = vpop.f32.mrb[12].mxu1 }
 0x1de   : > { %v756_v39 = vmul.f32 6.2831855, %v740_v32  ;;  %v726_v40 = vmul.f32 0.5, %v1047_v31  ;;  %1056 = vtanh.f32 %v701_v34  ;;  %v685_v41 = vadd.f32 %v995_v38, %v1222_v33  ;;  %v679_v42 = vpop.f32.mrb[13].mxu1 }
 0x1df   : > { %774 = vst.msk [vmem:[%s1239_s28 + $0x28] sm:$0xff] %vm768_vm2, %v757_v35  ;;  %v743_v43 = vadd.f32 0.5, %v727_v36  ;;  %1058 = vtanh.f32 %v700_v37  ;;  %v680_v44 = vadd.f32 %v1222_v33, %v679_v42 }
 0x1e0   : > { %v1049_v45 = vpop.eup %1048  ;;  %773 = vst.msk [vmem:[%s1239_s28 + $0x20] sm:$0xff] %vm768_vm2, %v756_v39  ;;  %v742_v46 = vadd.f32 0.5, %v726_v40  ;;  %v703_v47 = vmul.f32 0.5, %v685_v41 }
 0x1e1   : > { %v1051_v48 = vpop.eup %1050  ;;  %v759_v49 = vmul.f32 6.2831855, %v743_v43  ;;  %v729_v50 = vmul.f32 0.5, %v1049_v45  ;;  %v702_v51 = vmul.f32 0.5, %v680_v44 }
 0x1e2   : > { %v758_v52 = vmul.f32 6.2831855, %v742_v46  ;;  %v728_v53 = vmul.f32 0.5, %v1051_v48  ;;  %1060 = vtanh.f32 %v703_v47 }
 0x1e3   : > { %776 = vst.msk [vmem:[%s1239_s28 + $0x38] sm:$0xff] %vm768_vm2, %v759_v49  ;;  %v745_v54 = vadd.f32 0.5, %v729_v50  ;;  %1062 = vtanh.f32 %v702_v51 }
 0x1e4   : > { %v1053_v33 = vpop.eup %1052  ;;  %775 = vst.msk [vmem:[%s1239_s28 + $0x30] sm:$0xff] %vm768_vm2, %v758_v52  ;;  %v744_v55 = vadd.f32 0.5, %v728_v53 }
 0x1e5   : > { %v1055_v56 = vpop.eup %1054  ;;  %v761_v57 = vmul.f32 6.2831855, %v745_v54  ;;  %v731_v58 = vmul.f32 0.5, %v1053_v33 }
 0x1e6   : > { %v760_v59 = vmul.f32 6.2831855, %v744_v55  ;;  %v730_v60 = vmul.f32 0.5, %v1055_v56 }
 0x1e7   : > { %778 = vst.msk [vmem:[%s1239_s28 + $0x48] sm:$0xff] %vm768_vm2, %v761_v57  ;;  %v747_v61 = vadd.f32 0.5, %v731_v58 }
 0x1e8   : > { %v1057_v62 = vpop.eup %1056  ;;  %777 = vst.msk [vmem:[%s1239_s28 + $0x40] sm:$0xff] %vm768_vm2, %v760_v59  ;;  %v746_v63 = vadd.f32 0.5, %v730_v60 }
 0x1e9   : > { %v1059_v0 = vpop.eup %1058  ;;  %v763_v1 = vmul.f32 6.2831855, %v747_v61  ;;  %v733_v2 = vmul.f32 0.5, %v1057_v62 }
 0x1ea   : > { %v762_v3 = vmul.f32 6.2831855, %v746_v63  ;;  %v732_v4 = vmul.f32 0.5, %v1059_v0 }
 0x1eb   : > { %780 = vst.msk [vmem:[%s1239_s28 + $0x58] sm:$0xff] %vm768_vm2, %v763_v1  ;;  %v749_v5 = vadd.f32 0.5, %v733_v2 }
 0x1ec   : > { %v1061_v6 = vpop.eup %1060  ;;  %779 = vst.msk [vmem:[%s1239_s28 + $0x50] sm:$0xff] %vm768_vm2, %v762_v3  ;;  %v748_v7 = vadd.f32 0.5, %v732_v4 }
 0x1ed   : > { %v1063_v8 = vpop.eup %1062  ;;  %v765_v9 = vmul.f32 6.2831855, %v749_v5  ;;  %v735_v10 = vmul.f32 0.5, %v1061_v6 }
 0x1ee   : > { %v764_v11 = vmul.f32 6.2831855, %v748_v7  ;;  %v734_v12 = vmul.f32 0.5, %v1063_v8 }
 0x1ef   : > { %782 = vst.msk [vmem:[%s1239_s28 + $0x68] sm:$0xff] %vm768_vm2, %v765_v9  ;;  %v751_v13 = vadd.f32 0.5, %v735_v10 }
 0x1f0   : > { %781 = vst.msk [vmem:[%s1239_s28 + $0x60] sm:$0xff] %vm768_vm2, %v764_v11  ;;  %v750_v14 = vadd.f32 0.5, %v734_v12 }
 0x1f1   : > { %v767_v15 = vmul.f32 6.2831855, %v751_v13 }
 0x1f2   : > { %v766_v16 = vmul.f32 6.2831855, %v750_v14 }
 0x1f3   : > { %784 = vst.msk [vmem:[%s1239_s28 + $0x78] sm:$0xff] %vm768_vm2, %v767_v15 }
 0x1f4   : > { %783 = vst.msk [vmem:[%s1239_s28 + $0x70] sm:$0xff] %vm768_vm2, %v766_v16 }
 0x1f5 PF: > { %s15_s18 = sadd.s32 1, %s1070_s18  }
 0x1f6   : > { %p12_p4 = scmp.ge.s32.totalorder %s15_s18, 4  }
 0x1f8   :  { %14 = sbr.rel (!%p12_p4) target bundleno = 1 (0x1), region = 70 }

</bundles_post_ra>
